<compile_context>
chip_gen: v7x
topology: tpu7x:2x2x1
jax: 0.10.0
libtpu: 0.0.40
codegen_flags: <defaults>
</compile_context>

<pallas_src>
import functools

import jax
import jax.numpy as jnp
from jax.experimental import pallas as pl
from jax.experimental.pallas import tpu as pltpu


# ----------------------------------------------------------------------------
# Kernel: fused DoubleConv on lane-dense (N*H, W*C) activations.
# ----------------------------------------------------------------------------
def _double_conv_kernel(H, x_ref, m1_ref, g1_ref, b1_ref, m2_ref, g2_ref,
                        b2_ref, gmat_ref, o_ref):
    """x_ref: (N*H, W*Cin) f32; m*: (3*W*Ci, W*Co) bf16/f32 banded weights;
    g*/b*: (1, W*Co) f32; gmat: (W*Co, W*Co) f32; o_ref: (N*H, W*Co) f32."""
    NH = x_ref.shape[0]

    def neighbors(x2):
        # H halo via XLU sublane rotations + VPU border mask (zero rows at the
        # per-image H border).  W padding is folded into the banded weights.
        nh, wc = x2.shape
        row = jax.lax.broadcasted_iota(jnp.int32, (nh, wc), 0)
        up = pltpu.roll(x2, 1, 0)           # row r <- row r-1 (wraps)
        dn = pltpu.roll(x2, nh - 1, 0)      # row r <- row r+1 (wraps)
        up = jnp.where((row % H) == 0, jnp.zeros_like(up), up)
        dn = jnp.where((row % H) == (H - 1), jnp.zeros_like(dn), dn)
        # K-stacked conv operand: ONE MXU dot per conv, K = 3*W*Cin.
        return jnp.concatenate([up, x2, dn], axis=1)

    def bn_relu(y, gamma, beta, gmat, eps=1e-5):
        # Batch stats in f32: row reduction, then ONE (2, WC) x (WC, WC) dot
        # both reduces over W and broadcasts per-channel mean / E[y^2] back to
        # the packed lane layout (1/(N*H*W) folded into gmat).
        s = jnp.sum(y, axis=0, keepdims=True)
        ss = jnp.sum(y * y, axis=0, keepdims=True)
        stats = jnp.concatenate([s, ss], axis=0)                   # (2, WC)
        red = jnp.dot(stats, gmat, preferred_element_type=jnp.float32)
        mu, ey2 = red[0:1, :], red[1:2, :]
        var = ey2 - mu * mu
        scale = gamma * jax.lax.rsqrt(var + eps)
        shift = beta - mu * scale
        return jnp.maximum(y * scale + shift, 0.0)                 # affine+ReLU

    gmat = gmat_ref[...]
    cdt = m1_ref.dtype                      # MXU operand dtype (bf16 fast path)

    # conv1 (single K-stacked MXU dot) + BN + ReLU
    y1 = jnp.dot(neighbors(x_ref[...]).astype(cdt), m1_ref[...],
                 preferred_element_type=jnp.float32)
    y1 = bn_relu(y1, g1_ref[...], b1_ref[...], gmat)

    # conv2 + BN + ReLU
    y2 = jnp.dot(neighbors(y1).astype(cdt), m2_ref[...],
                 preferred_element_type=jnp.float32)
    y2 = bn_relu(y2, g2_ref[...], b2_ref[...], gmat)

    o_ref[...] = y2.astype(o_ref.dtype)


# ----------------------------------------------------------------------------
# One-time parameter preparation (hoisted out of the per-call path)
# ----------------------------------------------------------------------------
def _band_weights(w_oihw, W):
    """torch (Cout, Cin, 3, 3) weight -> (3*W*Cin, W*Cout) K-stacked banded mat.

    Block kh of the K axis holds M[kh][wi*Cin+ci, wo*Cout+co] =
    w[co, ci, kh, wi-wo+1] when 0 <= wi-wo+1 <= 2, else 0 (zero padding
    along W folded in)."""
    Cout, Cin = w_oihw.shape[0], w_oihw.shape[1]
    w_hwio = jnp.transpose(w_oihw, (2, 3, 1, 0)).astype(jnp.float32)  # (3,3,Ci,Co)
    wi = jnp.arange(W)[:, None]
    wo = jnp.arange(W)[None, :]
    kw = wi - wo + 1
    valid = (kw >= 0) & (kw <= 2)
    kw_c = jnp.clip(kw, 0, 2)
    mats = []
    for kh in range(3):
        t = w_hwio[kh][kw_c]                                  # (W, W, Cin, Cout)
        t = jnp.where(valid[:, :, None, None], t, 0.0)
        t = jnp.transpose(t, (0, 2, 1, 3)).reshape(W * Cin, W * Cout)
        mats.append(t)
    return jnp.concatenate(mats, axis=0)                      # (3*W*Cin, W*Cout)


def prepare_double_conv_params(w1, g1, b1, w2, g2, b2, *, N, H, W,
                               mxu_dtype=jnp.bfloat16):
    """Build banded weights / tiled BN params / group-mean matrix once."""
    Cout, Cin = w1.shape[0], w1.shape[1]
    assert w2.shape[0] == w2.shape[1] == Cout

    # Pad Cin so the packed input lane dim W*Cin is a full multiple of 128.
    if (W * Cin) % 128 != 0 and 128 % W == 0:
        cin_pad = ((Cin * W + 127) // 128) * (128 // W)
    else:
        cin_pad = Cin
    w1p = jnp.pad(w1.astype(jnp.float32),
                  ((0, 0), (0, cin_pad - Cin), (0, 0), (0, 0)))

    m1 = _band_weights(w1p, W).astype(mxu_dtype)              # (3*W*cin_pad, W*Cout)
    m2 = _band_weights(w2.astype(jnp.float32), W).astype(mxu_dtype)

    g1p = jnp.tile(g1.astype(jnp.float32), W).reshape(1, W * Cout)
    b1p = jnp.tile(b1.astype(jnp.float32), W).reshape(1, W * Cout)
    g2p = jnp.tile(g2.astype(jnp.float32), W).reshape(1, W * Cout)
    b2p = jnp.tile(b2.astype(jnp.float32), W).reshape(1, W * Cout)

    # gmat[i,j] = 1/(N*H*W) if lanes i,j carry the same channel, else 0.
    lane = jnp.arange(W * Cout)
    gmat = (lane[:, None] % Cout == lane[None, :] % Cout).astype(jnp.float32)
    gmat = gmat / float(N * H * W)

    return (m1, g1p, b1p, m2, g2p, b2p, gmat), cin_pad


# ----------------------------------------------------------------------------
# Jitted packed forward (only the pallas_call lives here)
# ----------------------------------------------------------------------------
@functools.partial(jax.jit, static_argnames=("h",))
def _double_conv_packed(x_packed, m1, g1, b1, m2, g2, b2, gmat, *, h):
    nh, wcin = x_packed.shape
    wcout = m1.shape[1]

    # FLOPs actually issued (banded dots + the two BN-stat dots).
    flops = (2 * nh * (3 * wcin) * wcout
             + 2 * nh * (3 * wcout) * wcout
             + 2 * 2 * (2 * wcout * wcout))
    bytes_accessed = (4 * (nh * wcin + nh * wcout + wcout * wcout + 4 * wcout)
                      + m1.dtype.itemsize * (m1.size + m2.size))

    kernel = functools.partial(_double_conv_kernel, h)
    return pl.pallas_call(
        kernel,
        out_shape=jax.ShapeDtypeStruct((nh, wcout), jnp.float32),
        grid=(1,),
        in_specs=[
            pl.BlockSpec((nh, wcin), lambda i: (0, 0)),
            pl.BlockSpec(m1.shape, lambda i: (0, 0)),
            pl.BlockSpec((1, wcout), lambda i: (0, 0)),
            pl.BlockSpec((1, wcout), lambda i: (0, 0)),
            pl.BlockSpec(m2.shape, lambda i: (0, 0)),
            pl.BlockSpec((1, wcout), lambda i: (0, 0)),
            pl.BlockSpec((1, wcout), lambda i: (0, 0)),
            pl.BlockSpec((wcout, wcout), lambda i: (0, 0)),
        ],
        out_specs=pl.BlockSpec((nh, wcout), lambda i: (0, 0)),
        compiler_params=pltpu.CompilerParams(
            dimension_semantics=("arbitrary",)),
        cost_estimate=pl.CostEstimate(flops=int(flops),
                                      transcendentals=2 * wcout,
                                      bytes_accessed=int(bytes_accessed)),
    )(x_packed, m1, g1, b1, m2, g2, b2, gmat)


# ----------------------------------------------------------------------------
# Boundary layout plumbing (only at the UNet graph edge)
# ----------------------------------------------------------------------------
def pack_nchw(x_nchw, cin_pad):
    N, C, H, W = x_nchw.shape
    x = jnp.transpose(x_nchw, (0, 2, 3, 1)).astype(jnp.float32)   # NHWC
    if cin_pad > C:
        x = jnp.pad(x, ((0, 0), (0, 0), (0, 0), (0, cin_pad - C)))
    return x.reshape(N * H, W * cin_pad)


def unpack_to_nchw(y_packed, N, H, W, Cout):
    y = y_packed.reshape(N, H, W, Cout)
    return jnp.transpose(y, (0, 3, 1, 2))


# ----------------------------------------------------------------------------
# Plain-JAX reference (matches torch DoubleConv forward, training-mode BN)
# ----------------------------------------------------------------------------
def _reference_forward(x, w1, g1, b1, w2, g2, b2, eps=1e-5):
    def conv(x, w):
        return jax.lax.conv_general_dilated(
            x, w, window_strides=(1, 1), padding=((1, 1), (1, 1)),
            dimension_numbers=("NCHW", "OIHW", "NCHW"))

    def bn_relu(y, g, b):
        mu = jnp.mean(y, axis=(0, 2, 3), keepdims=True)
        var = jnp.mean((y - mu) ** 2, axis=(0, 2, 3), keepdims=True)
        y = (y - mu) * jax.lax.rsqrt(var + eps)
        y = y * g.reshape(1, -1, 1, 1) + b.reshape(1, -1, 1, 1)
        return jnp.maximum(y, 0.0)

    y = bn_relu(conv(x, w1), g1, b1)
    y = bn_relu(conv(y, w2), g2, b2)
    return y


if __name__ == "__main__":
    # options implied: conv_kernel_size=3, conv_stride_rate=1, conv_padding=1,
    # conv_padding_style='zeros'; unet_conv_filters[0]=8 -> DoubleConv(4 -> 8).
    N, Cin, H, W = 2, 4, 16, 16
    Cout = 8

    key = jax.random.PRNGKey(0)
    k_x, k_w1, k_w2, k_g1, k_b1, k_g2, k_b2 = jax.random.split(key, 7)

    x = jax.random.normal(k_x, (N, Cin, H, W), jnp.float32)
    # torch-layout conv weights (O, I, kH, kW), bias=False
    w1 = jax.random.normal(k_w1, (Cout, Cin, 3, 3), jnp.float32) * 0.1
    w2 = jax.random.normal(k_w2, (Cout, Cout, 3, 3), jnp.float32) * 0.1
    # BatchNorm affine parameters (deterministic, non-trivial)
    g1 = 1.0 + 0.1 * jax.random.normal(k_g1, (Cout,), jnp.float32)
    b1 = 0.1 * jax.random.normal(k_b1, (Cout,), jnp.float32)
    g2 = 1.0 + 0.1 * jax.random.normal(k_g2, (Cout,), jnp.float32)
    b2 = 0.1 * jax.random.normal(k_b2, (Cout,), jnp.float32)

    ref = _reference_forward(x, w1, g1, b1, w2, g2, b2)

    # --- exactness check: f32 MXU operands ---
    params32, cin_pad = prepare_double_conv_params(
        w1, g1, b1, w2, g2, b2, N=N, H=H, W=W, mxu_dtype=jnp.float32)
    out32 = unpack_to_nchw(
        _double_conv_packed(pack_nchw(x, cin_pad), *params32, h=H),
        N, H, W, Cout)
    out32 = jax.block_until_ready(out32)
    assert out32.shape == (N, Cout, H, W)
    err32 = float(jnp.max(jnp.abs(out32 - ref)))
    assert jnp.allclose(out32, ref, atol=1e-3, rtol=1e-3), err32

    # --- fast path: bf16 MXU operands, f32 accumulation / BN statistics ---
    params16, cin_pad = prepare_double_conv_params(
        w1, g1, b1, w2, g2, b2, N=N, H=H, W=W, mxu_dtype=jnp.bfloat16)
    out16 = unpack_to_nchw(
        _double_conv_packed(pack_nchw(x, cin_pad), *params16, h=H),
        N, H, W, Cout)
    out16 = jax.block_until_ready(out16)
    err16 = float(jnp.max(jnp.abs(out16 - ref)))
    assert jnp.allclose(out16, ref, atol=1e-1, rtol=5e-2), err16

    print("KERNEL_OK")
</pallas_src>

<mosaic_0001>
module attributes {stable_mosaic.version = 11 : i64} {
  func.func @_double_conv_kernel(%arg0: i32, %arg1: memref<32x128xf32, #tpu.memory_space<vmem>>, %arg2: memref<384x128xf32, #tpu.memory_space<vmem>>, %arg3: memref<1x128xf32, #tpu.memory_space<vmem>>, %arg4: memref<1x128xf32, #tpu.memory_space<vmem>>, %arg5: memref<384x128xf32, #tpu.memory_space<vmem>>, %arg6: memref<1x128xf32, #tpu.memory_space<vmem>>, %arg7: memref<1x128xf32, #tpu.memory_space<vmem>>, %arg8: memref<128x128xf32, #tpu.memory_space<vmem>>, %arg9: memref<32x128xf32, #tpu.memory_space<vmem>>) attributes {dimension_semantics = [#tpu.dimension_semantics<arbitrary>], iteration_bounds = array<i64: 1>, scalar_prefetch = 0 : i64, scratch_operands = 0 : i64, tpu.core_type = #tpu.core_type<tc>, window_params = [{pipeline_mode = #tpu.pipeline_mode<synchronous>, transform_indices = @transform_0, window_bounds = array<i64: 32, 128>}, {pipeline_mode = #tpu.pipeline_mode<synchronous>, transform_indices = @transform_1, window_bounds = array<i64: 384, 128>}, {pipeline_mode = #tpu.pipeline_mode<synchronous>, transform_indices = @transform_2, window_bounds = array<i64: 1, 128>}, {pipeline_mode = #tpu.pipeline_mode<synchronous>, transform_indices = @transform_3, window_bounds = array<i64: 1, 128>}, {pipeline_mode = #tpu.pipeline_mode<synchronous>, transform_indices = @transform_4, window_bounds = array<i64: 384, 128>}, {pipeline_mode = #tpu.pipeline_mode<synchronous>, transform_indices = @transform_5, window_bounds = array<i64: 1, 128>}, {pipeline_mode = #tpu.pipeline_mode<synchronous>, transform_indices = @transform_6, window_bounds = array<i64: 1, 128>}, {pipeline_mode = #tpu.pipeline_mode<synchronous>, transform_indices = @transform_7, window_bounds = array<i64: 128, 128>}, {pipeline_mode = #tpu.pipeline_mode<synchronous>, transform_indices = @transform_8, window_bounds = array<i64: 32, 128>}]} {
    %c0 = arith.constant 0 : index
    %c0_0 = arith.constant 0 : index
    %0 = vector.load %arg8[%c0, %c0_0] : memref<128x128xf32, #tpu.memory_space<vmem>>, vector<128x128xf32>
    %c0_1 = arith.constant 0 : index
    %c0_2 = arith.constant 0 : index
    %1 = vector.load %arg1[%c0_1, %c0_2] : memref<32x128xf32, #tpu.memory_space<vmem>>, vector<32x128xf32>
    %2 = tpu.iota {dimensions = array<i32: 0>} : vector<32x128xi32>
    %c1_i32 = arith.constant 1 : i32
    %3 = tpu.dynamic_rotate %1 by %c1_i32 dim 0 : vector<32x128xf32>, i32 -> vector<32x128xf32>
    %c31_i32 = arith.constant 31 : i32
    %4 = tpu.dynamic_rotate %1 by %c31_i32 dim 0 : vector<32x128xf32>, i32 -> vector<32x128xf32>
    %c16_i32 = arith.constant 16 : i32
    %c0_i32 = arith.constant 0 : i32
    %5 = arith.cmpi eq, %c16_i32, %c0_i32 : i32
    %c1_i32_3 = arith.constant 1 : i32
    %6 = arith.select %5, %c1_i32_3, %c16_i32 : i32
    %7 = vector.broadcast %6 : i32 to vector<32x128xi32>
    %8 = arith.remsi %2, %7 : vector<32x128xi32>
    %c0_i32_4 = arith.constant 0 : i32
    %9 = vector.broadcast %c0_i32_4 : i32 to vector<32x128xi32>
    %10 = arith.cmpi ne, %8, %9 : vector<32x128xi32>
    %c0_i32_5 = arith.constant 0 : i32
    %11 = vector.broadcast %c0_i32_5 : i32 to vector<32x128xi32>
    %12 = arith.cmpi slt, %8, %11 : vector<32x128xi32>
    %c0_i32_6 = arith.constant 0 : i32
    %13 = arith.cmpi slt, %6, %c0_i32_6 : i32
    %14 = vector.broadcast %13 : i1 to vector<32x128xi1>
    %15 = vector.broadcast %14 : vector<32x128xi1> to vector<32x128xi1>
    %16 = arith.xori %12, %15 : vector<32x128xi1>
    %17 = arith.andi %16, %10 : vector<32x128xi1>
    %18 = vector.broadcast %6 : i32 to vector<32x128xi32>
    %19 = arith.addi %8, %18 : vector<32x128xi32>
    %20 = arith.select %17, %19, %8 : vector<32x128xi1>, vector<32x128xi32>
    %c0_i32_7 = arith.constant 0 : i32
    %21 = vector.broadcast %c0_i32_7 : i32 to vector<32x128xi32>
    %22 = arith.cmpi eq, %20, %21 : vector<32x128xi32>
    %cst = arith.constant 0.000000e+00 : f32
    %23 = vector.broadcast %cst : f32 to vector<32x128xf32>
    %24 = arith.select %22, %23, %3 : vector<32x128xi1>, vector<32x128xf32>
    %c16_i32_8 = arith.constant 16 : i32
    %c0_i32_9 = arith.constant 0 : i32
    %25 = arith.cmpi eq, %c16_i32_8, %c0_i32_9 : i32
    %c1_i32_10 = arith.constant 1 : i32
    %26 = arith.select %25, %c1_i32_10, %c16_i32_8 : i32
    %27 = vector.broadcast %26 : i32 to vector<32x128xi32>
    %28 = arith.remsi %2, %27 : vector<32x128xi32>
    %c0_i32_11 = arith.constant 0 : i32
    %29 = vector.broadcast %c0_i32_11 : i32 to vector<32x128xi32>
    %30 = arith.cmpi ne, %28, %29 : vector<32x128xi32>
    %c0_i32_12 = arith.constant 0 : i32
    %31 = vector.broadcast %c0_i32_12 : i32 to vector<32x128xi32>
    %32 = arith.cmpi slt, %28, %31 : vector<32x128xi32>
    %c0_i32_13 = arith.constant 0 : i32
    %33 = arith.cmpi slt, %26, %c0_i32_13 : i32
    %34 = vector.broadcast %33 : i1 to vector<32x128xi1>
    %35 = vector.broadcast %34 : vector<32x128xi1> to vector<32x128xi1>
    %36 = arith.xori %32, %35 : vector<32x128xi1>
    %37 = arith.andi %36, %30 : vector<32x128xi1>
    %38 = vector.broadcast %26 : i32 to vector<32x128xi32>
    %39 = arith.addi %28, %38 : vector<32x128xi32>
    %40 = arith.select %37, %39, %28 : vector<32x128xi1>, vector<32x128xi32>
    %c15_i32 = arith.constant 15 : i32
    %41 = vector.broadcast %c15_i32 : i32 to vector<32x128xi32>
    %42 = arith.cmpi eq, %40, %41 : vector<32x128xi32>
    %cst_14 = arith.constant 0.000000e+00 : f32
    %43 = vector.broadcast %cst_14 : f32 to vector<32x128xf32>
    %44 = arith.select %42, %43, %4 : vector<32x128xi1>, vector<32x128xf32>
    %45 = tpu.concatenate %24, %1, %44 in 1 : vector<32x128xf32>, vector<32x128xf32>, vector<32x128xf32> -> vector<32x384xf32>
    %c0_15 = arith.constant 0 : index
    %c0_16 = arith.constant 0 : index
    %46 = vector.load %arg2[%c0_15, %c0_16] : memref<384x128xf32, #tpu.memory_space<vmem>>, vector<384x128xf32>
    %cst_17 = arith.constant dense<0.000000e+00> : vector<32x128xf32>
    %47 = tpu.matmul %45, %46, %cst_17 {dimension_numbers = #tpu.dot_dimension_numbers<[1], [0], [0], [1], [0, 0, 1, 1], [], []>} : vector<32x384xf32>, vector<384x128xf32>, vector<32x128xf32> -> vector<32x128xf32>
    %c0_18 = arith.constant 0 : index
    %c0_19 = arith.constant 0 : index
    %48 = vector.load %arg3[%c0_18, %c0_19] : memref<1x128xf32, #tpu.memory_space<vmem>>, vector<1x128xf32>
    %c0_20 = arith.constant 0 : index
    %c0_21 = arith.constant 0 : index
    %49 = vector.load %arg4[%c0_20, %c0_21] : memref<1x128xf32, #tpu.memory_space<vmem>>, vector<1x128xf32>
    %cst_22 = arith.constant dense<0.000000e+00> : vector<128xf32>
    %50 = vector.multi_reduction <add>, %47, %cst_22 [0] : vector<32x128xf32> to vector<128xf32>
    %51 = vector.shape_cast %50 : vector<128xf32> to vector<1x128xf32>
    %52 = arith.mulf %47, %47 : vector<32x128xf32>
    %cst_23 = arith.constant dense<0.000000e+00> : vector<128xf32>
    %53 = vector.multi_reduction <add>, %52, %cst_23 [0] : vector<32x128xf32> to vector<128xf32>
    %54 = vector.shape_cast %53 : vector<128xf32> to vector<1x128xf32>
    %55 = tpu.concatenate %51, %54 in 0 : vector<1x128xf32>, vector<1x128xf32> -> vector<2x128xf32>
    %cst_24 = arith.constant dense<0.000000e+00> : vector<2x128xf32>
    %56 = tpu.matmul %55, %0, %cst_24 {dimension_numbers = #tpu.dot_dimension_numbers<[1], [0], [0], [1], [0, 0, 1, 1], [], []>} : vector<2x128xf32>, vector<128x128xf32>, vector<2x128xf32> -> vector<2x128xf32>
    %57 = vector.extract_strided_slice %56 {offsets = [0, 0], sizes = [1, 128], strides = [1, 1]} : vector<2x128xf32> to vector<1x128xf32>
    %58 = vector.extract_strided_slice %56 {offsets = [1, 0], sizes = [1, 128], strides = [1, 1]} : vector<2x128xf32> to vector<1x128xf32>
    %59 = arith.mulf %57, %57 : vector<1x128xf32>
    %60 = arith.subf %58, %59 : vector<1x128xf32>
    %cst_25 = arith.constant 9.99999974E-6 : f32
    %61 = vector.broadcast %cst_25 : f32 to vector<1x128xf32>
    %62 = arith.addf %60, %61 : vector<1x128xf32>
    %63 = math.rsqrt %62 : vector<1x128xf32>
    %64 = arith.mulf %48, %63 : vector<1x128xf32>
    %65 = arith.mulf %57, %64 : vector<1x128xf32>
    %66 = arith.subf %49, %65 : vector<1x128xf32>
    %67 = vector.broadcast %64 : vector<1x128xf32> to vector<32x128xf32>
    %68 = arith.mulf %47, %67 : vector<32x128xf32>
    %69 = vector.broadcast %66 : vector<1x128xf32> to vector<32x128xf32>
    %70 = arith.addf %68, %69 : vector<32x128xf32>
    %cst_26 = arith.constant 0.000000e+00 : f32
    %71 = vector.broadcast %cst_26 : f32 to vector<32x128xf32>
    %72 = arith.maximumf %70, %71 : vector<32x128xf32>
    %73 = tpu.iota {dimensions = array<i32: 0>} : vector<32x128xi32>
    %c1_i32_27 = arith.constant 1 : i32
    %74 = tpu.dynamic_rotate %72 by %c1_i32_27 dim 0 : vector<32x128xf32>, i32 -> vector<32x128xf32>
    %c31_i32_28 = arith.constant 31 : i32
    %75 = tpu.dynamic_rotate %72 by %c31_i32_28 dim 0 : vector<32x128xf32>, i32 -> vector<32x128xf32>
    %c16_i32_29 = arith.constant 16 : i32
    %c0_i32_30 = arith.constant 0 : i32
    %76 = arith.cmpi eq, %c16_i32_29, %c0_i32_30 : i32
    %c1_i32_31 = arith.constant 1 : i32
    %77 = arith.select %76, %c1_i32_31, %c16_i32_29 : i32
    %78 = vector.broadcast %77 : i32 to vector<32x128xi32>
    %79 = arith.remsi %73, %78 : vector<32x128xi32>
    %c0_i32_32 = arith.constant 0 : i32
    %80 = vector.broadcast %c0_i32_32 : i32 to vector<32x128xi32>
    %81 = arith.cmpi ne, %79, %80 : vector<32x128xi32>
    %c0_i32_33 = arith.constant 0 : i32
    %82 = vector.broadcast %c0_i32_33 : i32 to vector<32x128xi32>
    %83 = arith.cmpi slt, %79, %82 : vector<32x128xi32>
    %c0_i32_34 = arith.constant 0 : i32
    %84 = arith.cmpi slt, %77, %c0_i32_34 : i32
    %85 = vector.broadcast %84 : i1 to vector<32x128xi1>
    %86 = vector.broadcast %85 : vector<32x128xi1> to vector<32x128xi1>
    %87 = arith.xori %83, %86 : vector<32x128xi1>
    %88 = arith.andi %87, %81 : vector<32x128xi1>
    %89 = vector.broadcast %77 : i32 to vector<32x128xi32>
    %90 = arith.addi %79, %89 : vector<32x128xi32>
    %91 = arith.select %88, %90, %79 : vector<32x128xi1>, vector<32x128xi32>
    %c0_i32_35 = arith.constant 0 : i32
    %92 = vector.broadcast %c0_i32_35 : i32 to vector<32x128xi32>
    %93 = arith.cmpi eq, %91, %92 : vector<32x128xi32>
    %cst_36 = arith.constant 0.000000e+00 : f32
    %94 = vector.broadcast %cst_36 : f32 to vector<32x128xf32>
    %95 = arith.select %93, %94, %74 : vector<32x128xi1>, vector<32x128xf32>
    %c16_i32_37 = arith.constant 16 : i32
    %c0_i32_38 = arith.constant 0 : i32
    %96 = arith.cmpi eq, %c16_i32_37, %c0_i32_38 : i32
    %c1_i32_39 = arith.constant 1 : i32
    %97 = arith.select %96, %c1_i32_39, %c16_i32_37 : i32
    %98 = vector.broadcast %97 : i32 to vector<32x128xi32>
    %99 = arith.remsi %73, %98 : vector<32x128xi32>
    %c0_i32_40 = arith.constant 0 : i32
    %100 = vector.broadcast %c0_i32_40 : i32 to vector<32x128xi32>
    %101 = arith.cmpi ne, %99, %100 : vector<32x128xi32>
    %c0_i32_41 = arith.constant 0 : i32
    %102 = vector.broadcast %c0_i32_41 : i32 to vector<32x128xi32>
    %103 = arith.cmpi slt, %99, %102 : vector<32x128xi32>
    %c0_i32_42 = arith.constant 0 : i32
    %104 = arith.cmpi slt, %97, %c0_i32_42 : i32
    %105 = vector.broadcast %104 : i1 to vector<32x128xi1>
    %106 = vector.broadcast %105 : vector<32x128xi1> to vector<32x128xi1>
    %107 = arith.xori %103, %106 : vector<32x128xi1>
    %108 = arith.andi %107, %101 : vector<32x128xi1>
    %109 = vector.broadcast %97 : i32 to vector<32x128xi32>
    %110 = arith.addi %99, %109 : vector<32x128xi32>
    %111 = arith.select %108, %110, %99 : vector<32x128xi1>, vector<32x128xi32>
    %c15_i32_43 = arith.constant 15 : i32
    %112 = vector.broadcast %c15_i32_43 : i32 to vector<32x128xi32>
    %113 = arith.cmpi eq, %111, %112 : vector<32x128xi32>
    %cst_44 = arith.constant 0.000000e+00 : f32
    %114 = vector.broadcast %cst_44 : f32 to vector<32x128xf32>
    %115 = arith.select %113, %114, %75 : vector<32x128xi1>, vector<32x128xf32>
    %116 = tpu.concatenate %95, %72, %115 in 1 : vector<32x128xf32>, vector<32x128xf32>, vector<32x128xf32> -> vector<32x384xf32>
    %c0_45 = arith.constant 0 : index
    %c0_46 = arith.constant 0 : index
    %117 = vector.load %arg5[%c0_45, %c0_46] : memref<384x128xf32, #tpu.memory_space<vmem>>, vector<384x128xf32>
    %cst_47 = arith.constant dense<0.000000e+00> : vector<32x128xf32>
    %118 = tpu.matmul %116, %117, %cst_47 {dimension_numbers = #tpu.dot_dimension_numbers<[1], [0], [0], [1], [0, 0, 1, 1], [], []>} : vector<32x384xf32>, vector<384x128xf32>, vector<32x128xf32> -> vector<32x128xf32>
    %c0_48 = arith.constant 0 : index
    %c0_49 = arith.constant 0 : index
    %119 = vector.load %arg6[%c0_48, %c0_49] : memref<1x128xf32, #tpu.memory_space<vmem>>, vector<1x128xf32>
    %c0_50 = arith.constant 0 : index
    %c0_51 = arith.constant 0 : index
    %120 = vector.load %arg7[%c0_50, %c0_51] : memref<1x128xf32, #tpu.memory_space<vmem>>, vector<1x128xf32>
    %cst_52 = arith.constant dense<0.000000e+00> : vector<128xf32>
    %121 = vector.multi_reduction <add>, %118, %cst_52 [0] : vector<32x128xf32> to vector<128xf32>
    %122 = vector.shape_cast %121 : vector<128xf32> to vector<1x128xf32>
    %123 = arith.mulf %118, %118 : vector<32x128xf32>
    %cst_53 = arith.constant dense<0.000000e+00> : vector<128xf32>
    %124 = vector.multi_reduction <add>, %123, %cst_53 [0] : vector<32x128xf32> to vector<128xf32>
    %125 = vector.shape_cast %124 : vector<128xf32> to vector<1x128xf32>
    %126 = tpu.concatenate %122, %125 in 0 : vector<1x128xf32>, vector<1x128xf32> -> vector<2x128xf32>
    %cst_54 = arith.constant dense<0.000000e+00> : vector<2x128xf32>
    %127 = tpu.matmul %126, %0, %cst_54 {dimension_numbers = #tpu.dot_dimension_numbers<[1], [0], [0], [1], [0, 0, 1, 1], [], []>} : vector<2x128xf32>, vector<128x128xf32>, vector<2x128xf32> -> vector<2x128xf32>
    %128 = vector.extract_strided_slice %127 {offsets = [0, 0], sizes = [1, 128], strides = [1, 1]} : vector<2x128xf32> to vector<1x128xf32>
    %129 = vector.extract_strided_slice %127 {offsets = [1, 0], sizes = [1, 128], strides = [1, 1]} : vector<2x128xf32> to vector<1x128xf32>
    %130 = arith.mulf %128, %128 : vector<1x128xf32>
    %131 = arith.subf %129, %130 : vector<1x128xf32>
    %cst_55 = arith.constant 9.99999974E-6 : f32
    %132 = vector.broadcast %cst_55 : f32 to vector<1x128xf32>
    %133 = arith.addf %131, %132 : vector<1x128xf32>
    %134 = math.rsqrt %133 : vector<1x128xf32>
    %135 = arith.mulf %119, %134 : vector<1x128xf32>
    %136 = arith.mulf %128, %135 : vector<1x128xf32>
    %137 = arith.subf %120, %136 : vector<1x128xf32>
    %138 = vector.broadcast %135 : vector<1x128xf32> to vector<32x128xf32>
    %139 = arith.mulf %118, %138 : vector<32x128xf32>
    %140 = vector.broadcast %137 : vector<1x128xf32> to vector<32x128xf32>
    %141 = arith.addf %139, %140 : vector<32x128xf32>
    %cst_56 = arith.constant 0.000000e+00 : f32
    %142 = vector.broadcast %cst_56 : f32 to vector<32x128xf32>
    %143 = arith.maximumf %141, %142 : vector<32x128xf32>
    %c0_57 = arith.constant 0 : index
    %c0_58 = arith.constant 0 : index
    %144 = vector.load %arg9[%c0_57, %c0_58] : memref<32x128xf32, #tpu.memory_space<vmem>>, vector<32x128xf32>
    tpu.vector_store %arg9[%c0_57, %c0_58], %143 {strides = array<i32>} : memref<32x128xf32, #tpu.memory_space<vmem>>, vector<32x128xf32>,
    return
  }
  func.func @transform_0(%arg0: i32) -> (i32, i32) {
    %c0_i32 = arith.constant 0 : i32
    %c0_i32_0 = arith.constant 0 : i32
    %c0_i32_1 = arith.constant 0 : i32
    return %c0_i32, %c0_i32_0 : i32, i32
  }
  func.func @transform_1(%arg0: i32) -> (i32, i32) {
    %c0_i32 = arith.constant 0 : i32
    %c0_i32_0 = arith.constant 0 : i32
    %c0_i32_1 = arith.constant 0 : i32
    return %c0_i32, %c0_i32_0 : i32, i32
  }
  func.func @transform_2(%arg0: i32) -> (i32, i32) {
    %c0_i32 = arith.constant 0 : i32
    %c0_i32_0 = arith.constant 0 : i32
    %c0_i32_1 = arith.constant 0 : i32
    return %c0_i32, %c0_i32_0 : i32, i32
  }
  func.func @transform_3(%arg0: i32) -> (i32, i32) {
    %c0_i32 = arith.constant 0 : i32
    %c0_i32_0 = arith.constant 0 : i32
    %c0_i32_1 = arith.constant 0 : i32
    return %c0_i32, %c0_i32_0 : i32, i32
  }
  func.func @transform_4(%arg0: i32) -> (i32, i32) {
    %c0_i32 = arith.constant 0 : i32
    %c0_i32_0 = arith.constant 0 : i32
    %c0_i32_1 = arith.constant 0 : i32
    return %c0_i32, %c0_i32_0 : i32, i32
  }
  func.func @transform_5(%arg0: i32) -> (i32, i32) {
    %c0_i32 = arith.constant 0 : i32
    %c0_i32_0 = arith.constant 0 : i32
    %c0_i32_1 = arith.constant 0 : i32
    return %c0_i32, %c0_i32_0 : i32, i32
  }
  func.func @transform_6(%arg0: i32) -> (i32, i32) {
    %c0_i32 = arith.constant 0 : i32
    %c0_i32_0 = arith.constant 0 : i32
    %c0_i32_1 = arith.constant 0 : i32
    return %c0_i32, %c0_i32_0 : i32, i32
  }
  func.func @transform_7(%arg0: i32) -> (i32, i32) {
    %c0_i32 = arith.constant 0 : i32
    %c0_i32_0 = arith.constant 0 : i32
    %c0_i32_1 = arith.constant 0 : i32
    return %c0_i32, %c0_i32_0 : i32, i32
  }
  func.func @transform_8(%arg0: i32) -> (i32, i32) {
    %c0_i32 = arith.constant 0 : i32
    %c0_i32_0 = arith.constant 0 : i32
    %c0_i32_1 = arith.constant 0 : i32
    return %c0_i32, %c0_i32_0 : i32, i32
  }
}

</mosaic_0001>

<bundles_post_ra>
// kernel: _double_conv_packed.1
= control target key start
LH: loop header
LB: loop body
LE: loop exit
PB: predicated region body
PF: predicated region fallthrough
CT: control target
= control target key end

     0   :  { %13 = vsyncpa [#allocation3], 0  ;;  %s1940_s0 = inlined_call_operand.hbm [shape: f32[32,128], index: 0, kind: input, shape index: {}]   ;;  %s1941_s1 = inlined_call_operand.hbm [shape: f32[384,128], index: 1, kind: input, shape index: {}]   ;;  %s1942_s2 = inlined_call_operand.vmem [shape: f32[1,128], index: 2, kind: input, shape index: {}]   ;;  %s1943_s3 = inlined_call_operand.vmem [shape: f32[1,128], index: 3, kind: input, shape index: {}]   ;;  %s1944_s4 = inlined_call_operand.hbm [shape: f32[384,128], index: 4, kind: input, shape index: {}]   ;;  %s1945_s5 = inlined_call_operand.vmem [shape: f32[1,128], index: 5, kind: input, shape index: {}]   ;;  %s1946_s6 = inlined_call_operand.vmem [shape: f32[1,128], index: 6, kind: input, shape index: {}]   ;;  %s1947_s7 = inlined_call_operand.hbm [shape: f32[128,128], index: 7, kind: input, shape index: {}]   ;;  %s1948_s8 = inlined_call_operand.hbm [shape: f32[32,128], index: 8, kind: output, shape index: {}]  }
   0x1   :  { %14 = vsyncpa [#allocation6], 0 }
   0x2   :  { %15 = vsyncpa [#allocation9], 0 }
   0x3   :  { %16 = vsyncpa [#allocation4], 0  ;;  %s1605_s27 = smov [#allocation5]   ;;  %s1606_s29 = smov [#allocation2]  }
   0x4   :  { %s34_s28 = sshll.u32 %s1605_s27, 4  ;;  %s22_s30 = sshll.u32 %s1606_s29, 4  ;;  %s35_s28 = int_to_ptr.vmem [resolvable:$true] %s34_s28  ;;  %s1661_s30 = int_to_ptr.vmem [resolvable:$true] %s22_s30 }
   0x5   :  { %s1487_s11 = scalar_lea.hbm %s1941_s1, 6144 }
   0x6   :  { %p1488_p0 = scmp.ne.s32.totalorder %s1941_s1, %s1487_s11  ;;  %p1491_p1 = scmp.lt.u32.totalorder %s1487_s11, %s1941_s1 }
   0x8   :  { %p1493_p2 = pnand %p1491_p1, %p1488_p0 }
   0xa   :  { %1496 = shalt.err (!%p1493_p2)
}
   0xb   :  { %s1497_s16 = scalar_lea.vmem %s35_s28, 6144  ;;  %p1502_p4 = scmp.lt.s32.totalorder %s35_s28, %s35_s28 }
   0xc   :  { %p1498_p3 = scmp.ne.s32.totalorder %s35_s28, %s1497_s16  ;;  %p1503_p5 = scmp.lt.s32.totalorder %s1497_s16, %s1497_s16 }
   0xe   :  { %p1504_p6 = por %p1503_p5, %p1502_p4 }
  0x10   :  { %p1505_p7 = pnand %p1504_p6, %p1498_p3 }
  0x12   :  { %1508 = shalt.err (!%p1505_p7)
}
  0x13   :  { %s1607_s17 = smov 128   ;;  %s1608_s18 = smov 8  }
  0x14   :  { %40 = dma.hbm_to_vmem [thread:$0]  %s1941_s1, 6144, %s35_s28, [#allocation6], %s1607_s17, %s1607_s17, %s1608_s18  }
  0x15   :  { %s1509_s23 = scalar_lea.hbm %s1940_s0, 512 }
  0x16   :  { %p1510_p8 = scmp.ne.s32.totalorder %s1940_s0, %s1509_s23  ;;  %p1513_p9 = scmp.lt.u32.totalorder %s1509_s23, %s1940_s0 }
  0x18   :  { %p1515_p10 = pnand %p1513_p9, %p1510_p8 }
  0x1a   :  { %1518 = shalt.err (!%p1515_p10)
}
  0x1b   :  { %s1519_s29 = scalar_lea.vmem %s1661_s30, 512  ;;  %p1524_p12 = scmp.lt.s32.totalorder %s1661_s30, %s1661_s30 }
  0x1c   :  { %p1520_p11 = scmp.ne.s32.totalorder %s1661_s30, %s1519_s29  ;;  %p1525_p13 = scmp.lt.s32.totalorder %s1519_s29, %s1519_s29 }
  0x1e   :  { %p1526_p0 = por %p1525_p13, %p1524_p12 }
  0x20   :  { %p1527_p1 = pnand %p1526_p0, %p1520_p11 }
  0x22   :  { %1530 = shalt.err (!%p1527_p1)
}
  0x23   :  { %28 = dma.hbm_to_vmem [thread:$0]  %s1940_s0, 512, %s1661_s30, [#allocation3], %s1607_s17, %s1607_s17, %s1608_s18  }
  0x24   :  { %s1609_s9 = smov [#allocation7]   ;;  %s1610_s11 = smov [#allocation8]  }
  0x25   :  { %s50_s10 = sshll.u32 %s1609_s9, 4  ;;  %s66_s12 = sshll.u32 %s1610_s11, 4  ;;  %s51_s10 = int_to_ptr.vmem [resolvable:$true] %s50_s10  ;;  %s1698_s12 = int_to_ptr.vmem [resolvable:$true] %s66_s12 }
  0x26   :  { %s1531_s15 = scalar_lea.hbm %s1944_s4, 6144 }
  0x27   :  { %p1532_p2 = scmp.ne.s32.totalorder %s1944_s4, %s1531_s15  ;;  %p1535_p3 = scmp.lt.u32.totalorder %s1531_s15, %s1944_s4 }
  0x29   :  { %p1537_p4 = pnand %p1535_p3, %p1532_p2 }
  0x2b   :  { %1540 = shalt.err (!%p1537_p4)
}
  0x2c   :  { %s1541_s0 = scalar_lea.vmem %s51_s10, 6144  ;;  %p1546_p6 = scmp.lt.s32.totalorder %s51_s10, %s51_s10 }
  0x2d   :  { %p1542_p5 = scmp.ne.s32.totalorder %s51_s10, %s1541_s0  ;;  %p1547_p7 = scmp.lt.s32.totalorder %s1541_s0, %s1541_s0 }
  0x2f   :  { %p1548_p8 = por %p1547_p7, %p1546_p6 }
  0x31   :  { %p1549_p9 = pnand %p1548_p8, %p1542_p5 }
  0x33   :  { %1552 = shalt.err (!%p1549_p9)
}
  0x34   :  { %56 = dma.hbm_to_vmem [thread:$0]  %s1944_s4, 6144, %s51_s10, [#allocation6], %s1607_s17, %s1607_s17, %s1608_s18  }
  0x35   :  { %s1553_s25 = scalar_lea.hbm %s1947_s7, 2048 }
  0x36   :  { %p1554_p10 = scmp.ne.s32.totalorder %s1947_s7, %s1553_s25  ;;  %p1557_p11 = scmp.lt.u32.totalorder %s1553_s25, %s1947_s7 }
  0x38   :  { %p1559_p12 = pnand %p1557_p11, %p1554_p10 }
  0x3a   :  { %1562 = shalt.err (!%p1559_p12)
}
  0x3b   :  { %s1563_s28 = scalar_lea.vmem %s1698_s12, 2048  ;;  %p1568_p0 = scmp.lt.s32.totalorder %s1698_s12, %s1698_s12 }
  0x3c   :  { %p1564_p13 = scmp.ne.s32.totalorder %s1698_s12, %s1563_s28  ;;  %p1569_p1 = scmp.lt.s32.totalorder %s1563_s28, %s1563_s28 }
  0x3e   :  { %p1570_p2 = por %p1569_p1, %p1568_p0 }
  0x40   :  { %p1571_p3 = pnand %p1570_p2, %p1564_p13 }
  0x42   :  { %1574 = shalt.err (!%p1571_p3)
}
  0x43   :  { %72 = dma.hbm_to_vmem [thread:$0]  %s1947_s7, 2048, %s1698_s12, [#allocation9], %s1607_s17, %s1607_s17, %s1608_s18  }
  0x44   :  { %1597 = dma.done.wait [#allocation3], 512  }
  0x45   :  { %1598 = vsyncadd [#allocation3], 4294966784 }
  0x46   :  { %1599 = dma.done.wait [#allocation6], 12288  }
  0x47   :  { %1600 = vsyncadd [#allocation6], 4294955008 }
  0x48   :  { %1601 = dma.done.wait [#allocation9], 2048  }
  0x49   :  { %1602 = vsyncadd [#allocation9], 4294965248  ;;  %v208_v0 = vld [vmem:[#allocation5 + $0x80] sm:$0xff]  ;;  %v209_v1 = vld [vmem:[#allocation5 + $0x88] sm:$0xff]  ;;  %v105_v37 = vlaneseq  ;;  %vm1612_vm6 = vmmov 0   ;;  %vm434_vm7 = vcmask 1040384  }
  0x4a   :  { %v192_v2 = vld [vmem:[#allocation5] sm:$0xff]  ;;  %v1296_v3 = vpack.c.bf16 %v209_v1, %v208_v0  ;;  %v193_v4 = vld [vmem:[#allocation5 + $0x8] sm:$0xff]  ;;  %v210_v9 = vld [vmem:[#allocation5 + $0x90] sm:$0xff]  ;;  %s1615_s15 = smov [#allocation10]  }
  0x4b   :  { %v224_v5 = vld [vmem:[#allocation5 + $0x100] sm:$0xff]  ;;  %v225_v6 = vld [vmem:[#allocation5 + $0x108] sm:$0xff]  ;;  %v1298_v7 = vpack.c.bf16 %v193_v4, %v192_v2  ;;  %v211_v10 = vld [vmem:[#allocation5 + $0x98] sm:$0xff]  ;;  %v1735_v47 = vshrl.u32 %v105_v37, 7  ;;  %s954_s16 = sshll.u32 %s1615_s15, 4  ;;  %s955_s16 = int_to_ptr.vmem [resolvable:$true] %s954_s16 }
  0x4c   :  { %v1328_v8 = vpack.c.bf16 %v225_v6, %v224_v5  ;;  %v194_v11 = vld [vmem:[#allocation5 + $0x10] sm:$0xff]  ;;  %1297 = vmatprep.subr.bf16.mxu0 %v1296_v3  ;;  %v1300_v12 = vpack.c.bf16 %v211_v10, %v210_v9  ;;  %v195_v13 = vld [vmem:[#allocation5 + $0x18] sm:$0xff]  ;;  %v212_v18 = vld [vmem:[#allocation5 + $0xa0] sm:$0xff]  ;;  %p1580_p5 = scmp.lt.s32.totalorder %s955_s16, %s955_s16 }
  0x4d   :  { %v226_v14 = vld [vmem:[#allocation5 + $0x110] sm:$0xff]  ;;  %v227_v15 = vld [vmem:[#allocation5 + $0x118] sm:$0xff]  ;;  %1299 = vmatpush3.bf16.msra.mxu0 %v1298_v7  ;;  %v1302_v16 = vpack.c.bf16 %v195_v13, %v194_v11  ;;  %v213_v19 = vld [vmem:[#allocation5 + $0xa8] sm:$0xff]  ;;  %vm123_vm0 = vcmp.lt.s32.totalorder %v1735_v47, 7  ;;  %vm114_vm1 = vcmp.lt.s32.totalorder %v1735_v47, 1 }
  0x4e   :  { %1329 = vmatprep.subr.bf16.mxu1 %v1328_v8  ;;  %v1332_v17 = vpack.c.bf16 %v227_v15, %v226_v14  ;;  %v196_v20 = vld [vmem:[#allocation5 + $0x20] sm:$0xff]  ;;  %1301 = vmatprep.subr.bf16.mxu0 %v1300_v12  ;;  %v1304_v21 = vpack.c.bf16 %v213_v19, %v212_v18  ;;  %v197_v22 = vld [vmem:[#allocation5 + $0x28] sm:$0xff]  ;;  %v214_v26 = vld [vmem:[#allocation5 + $0xb0] sm:$0xff]  ;;  %v107_v14 = vadd.s32 8, %v1735_v47 }
  0x4f   :  { %1331 = vmatpush3.bf16.msra.mxu1 %v1328_v8  ;;  %v228_v23 = vld [vmem:[#allocation5 + $0x120] sm:$0xff]  ;;  %v229_v24 = vld [vmem:[#allocation5 + $0x128] sm:$0xff]  ;;  %v215_v27 = vld [vmem:[#allocation5 + $0xb8] sm:$0xff]  ;;  %v1306_v30 = vpack.c.bf16 %v197_v22, %v196_v20  ;;  %v132_v20 = vand.u32 15, %v1735_v47 }
  0x50   :  { %1333 = vmatprep.subr.bf16.mxu1 %v1332_v17  ;;  %v1336_v25 = vpack.c.bf16 %v229_v24, %v228_v23  ;;  %v230_v28 = vld [vmem:[#allocation5 + $0x130] sm:$0xff]  ;;  %v231_v29 = vld [vmem:[#allocation5 + $0x138] sm:$0xff]  ;;  %v1308_v31 = vpack.c.bf16 %v215_v27, %v214_v26  ;;  %v216_v35 = vld [vmem:[#allocation5 + $0xc0] sm:$0xff]  ;;  %v139_v22 = vand.u32 15, %v107_v14  ;;  %v109_v23 = vadd.s32 24, %v1735_v47 }
  0x51   :  { %1303 = vmatpush3.bf16.msra.mxu0 %v1302_v16  ;;  %v198_v32 = vld [vmem:[#allocation5 + $0x30] sm:$0xff]  ;;  %v199_v33 = vld [vmem:[#allocation5 + $0x38] sm:$0xff]  ;;  %v1340_v34 = vpack.c.bf16 %v231_v29, %v230_v28  ;;  %v217_v36 = vld [vmem:[#allocation5 + $0xc8] sm:$0xff]  ;;  %vm1756_vm2 = vcmp.ne.s32.totalorder %v132_v20, 0  ;;  %v108_v28 = vadd.s32 16, %v1735_v47 }
  0x52   :  { %1305 = vmatprep.subr.bf16.mxu0 %v1304_v21  ;;  %v232_v38 = vld [vmem:[#allocation5 + $0x140] sm:$0xff]  ;;  %v233_v39 = vld [vmem:[#allocation5 + $0x148] sm:$0xff]  ;;  %v1310_v40 = vpack.c.bf16 %v199_v33, %v198_v32  ;;  %v1312_v41 = vpack.c.bf16 %v217_v36, %v216_v35  ;;  %v218_v45 = vld [vmem:[#allocation5 + $0xd0] sm:$0xff]  ;;  %vm1764_vm3 = vcmp.ne.s32.totalorder %v139_v22, 15 }
  0x53   :  { %1335 = vmatpush3.bf16.msra.mxu1 %v1332_v17  ;;  %v200_v42 = vld [vmem:[#allocation5 + $0x40] sm:$0xff]  ;;  %v201_v43 = vld [vmem:[#allocation5 + $0x48] sm:$0xff]  ;;  %v1344_v44 = vpack.c.bf16 %v233_v39, %v232_v38  ;;  %v219_v46 = vld [vmem:[#allocation5 + $0xd8] sm:$0xff]  ;;  %v146_v35 = vand.u32 15, %v108_v28 }
  0x54   :  { %1337 = vmatprep.subr.bf16.mxu1 %v1336_v25  ;;  %v234_v48 = vld [vmem:[#allocation5 + $0x150] sm:$0xff]  ;;  %v235_v49 = vld [vmem:[#allocation5 + $0x158] sm:$0xff]  ;;  %v1314_v50 = vpack.c.bf16 %v201_v43, %v200_v42  ;;  %v1737_v51 = vld [vmem:[#allocation2] sm:$0xff]  ;;  %v1316_v53 = vpack.c.bf16 %v219_v46, %v218_v45 }
  0x55   :  { %1307 = vmatpush3.bf16.msra.mxu0 %v1306_v30  ;;  %v1739_v52 = vld [vmem:[#allocation2 + $0x8] sm:$0xff]  ;;  %v202_v54 = vld [vmem:[#allocation5 + $0x50] sm:$0xff]  ;;  %v203_v55 = vld [vmem:[#allocation5 + $0x58] sm:$0xff]  ;;  %v119_v56 = vrot.slane %v1737_v51, 1  ;;  %v1348_v58 = vpack.c.bf16 %v235_v49, %v234_v48  ;;  %304 = vmatprep.mubr.f32.mxu0 %v1737_v51  ;;  %v110_v18 = vrot.slane %v1737_v51, 7  ;;  %vm1787_vm5 = vcmp.ne.s32.totalorder %v146_v35, 0 }
  0x56   :  { %1309 = vmatprep.subr.bf16.mxu0 %v1308_v31  ;;  %v120_v57 = vrot.slane %v1739_v52, 1  ;;  %v220_v59 = vld [vmem:[#allocation5 + $0xe0] sm:$0xff]  ;;  %v221_v60 = vld [vmem:[#allocation5 + $0xe8] sm:$0xff]  ;;  %v1318_v0 = vpack.c.bf16 %v203_v55, %v202_v54  ;;  %v222_v5 = vld [vmem:[#allocation5 + $0xf0] sm:$0xff]  ;;  %v111_v27 = vrot.slane %v1739_v52, 7  ;;  %v153_v31 = vand.u32 15, %v109_v23 }
  0x57   :  { %1339 = vmatpush3.bf16.msra.mxu1 %v1336_v25  ;;  %v236_v61 = vld [vmem:[#allocation5 + $0x160] sm:$0xff]  ;;  %v237_v62 = vld [vmem:[#allocation5 + $0x168] sm:$0xff]  ;;  %v1320_v1 = vpack.c.bf16 %v221_v60, %v220_v59  ;;  %v223_v6 = vld [vmem:[#allocation5 + $0xf8] sm:$0xff] }
  0x58   :  { %1341 = vmatprep.subr.bf16.mxu1 %v1340_v34  ;;  %v126_v63 = vsel %vm123_vm0, %v119_v56, %v120_v57  ;;  %v204_v2 = vld [vmem:[#allocation5 + $0x60] sm:$0xff]  ;;  %v205_v3 = vld [vmem:[#allocation5 + $0x68] sm:$0xff]  ;;  %v1352_v4 = vpack.c.bf16 %v237_v62, %v236_v61  ;;  %v238_v7 = vld [vmem:[#allocation5 + $0x170] sm:$0xff]  ;;  %v1324_v10 = vpack.c.bf16 %v223_v6, %v222_v5  ;;  %v117_v33 = vsel %vm114_vm1, %v110_v18, %v111_v27 }
  0x59   :  { %1311 = vmatpush3.bf16.msra.mxu0 %v1310_v40  ;;  %1182 = vmatprep.mubr.f32.mxu1 %v126_v63  ;;  %v239_v8 = vld [vmem:[#allocation5 + $0x178] sm:$0xff]  ;;  %v1322_v9 = vpack.c.bf16 %v205_v3, %v204_v2  ;;  %v206_v11 = vld [vmem:[#allocation5 + $0x70] sm:$0xff]  ;;  %vm1781_vm4 = vcmp.ne.s32.totalorder %v153_v31, 15  ;;  %v86_v42 = vld [vmem:[#allocation8 + $0x8] sm:$0xff]  ;;  %v1613_v2 = vmov 0.0  }
  0x5a   :  { %1313 = vmatprep.subr.bf16.mxu0 %v1312_v41  ;;  %v207_v12 = vld [vmem:[#allocation5 + $0x78] sm:$0xff]  ;;  %v1356_v15 = vpack.c.bf16 %v239_v8, %v238_v7  ;;  %v103_v16 = vld [vmem:[#allocation2 + $0x10] sm:$0xff]  ;;  %v85_v41 = vld [vmem:[#allocation8] sm:$0xff] }
  0x5b   :  { %1343 = vmatpush3.bf16.msra.mxu1 %v1340_v34  ;;  %v104_v13 = vld [vmem:[#allocation2 + $0x18] sm:$0xff]  ;;  %v1326_v17 = vpack.c.bf16 %v207_v12, %v206_v11  ;;  %v121_v21 = vrot.slane %v103_v16, 1  ;;  %v112_v34 = vrot.slane %v103_v16, 7  ;;  %v1797_v43 = vpack.c.bf16 %v86_v42, %v85_v41  ;;  %v87_v45 = vld [vmem:[#allocation8 + $0x10] sm:$0xff]  ;;  %v89_v49 = vld [vmem:[#allocation8 + $0x20] sm:$0xff] }
  0x5c   :  { %1345 = vmatprep.subr.bf16.mxu1 %v1344_v44  ;;  %v113_v19 = vrot.slane %v104_v13, 7  ;;  %v122_v24 = vrot.slane %v104_v13, 1  ;;  %v88_v46 = vld [vmem:[#allocation8 + $0x18] sm:$0xff]  ;;  %v93_v55 = vld [vmem:[#allocation8 + $0x40] sm:$0xff]  ;;  %v98_v62 = vld [vmem:[#allocation8 + $0x68] sm:$0xff] }
  0x5d   :  { %1315 = vmatpush3.bf16.msra.mxu0 %v1314_v50  ;;  %v125_v29 = vsel %vm123_vm0, %v120_v57, %v121_v21  ;;  %v116_v38 = vsel %vm114_vm1, %v111_v27, %v112_v34  ;;  %v1802_v48 = vpack.c.bf16 %v88_v46, %v87_v45  ;;  %v90_v50 = vld [vmem:[#allocation8 + $0x28] sm:$0xff]  ;;  %v96_v59 = vld [vmem:[#allocation8 + $0x58] sm:$0xff]  ;;  %v97_v61 = vld [vmem:[#allocation8 + $0x60] sm:$0xff] }
  0x5e   :  { %1317 = vmatprep.subr.bf16.mxu0 %v1316_v53  ;;  %v118_v25 = vsel %vm114_vm1, %v113_v19, %v110_v18  ;;  %v124_v32 = vsel %vm123_vm0, %v121_v21, %v122_v24  ;;  %v127_v36 = vsel %vm123_vm0, %v122_v24, %v119_v56  ;;  %v115_v40 = vsel %vm114_vm1, %v112_v34, %v113_v19  ;;  %v92_v53 = vld [vmem:[#allocation8 + $0x38] sm:$0xff]  ;;  %v94_v56 = vld [vmem:[#allocation8 + $0x48] sm:$0xff] }
  0x5f   :  { %1347 = vmatpush3.bf16.msra.mxu1 %v1344_v44  ;;  %v1611_v44 = vmov 0.0|0.0   ;;  %v1806_v51 = vpack.c.bf16 %v90_v50, %v89_v49  ;;  %v1814_v57 = vpack.c.bf16 %v94_v56, %v93_v55  ;;  %v1822_v63 = vpack.c.bf16 %v98_v62, %v97_v61  ;;  %v581_v62 = vld [vmem:[#allocation7] sm:$0xff] }
  0x60   :  { %1349 = vmatprep.subr.bf16.mxu1 %v1348_v58 }
  0x61   :  { %1319 = vmatpush3.bf16.msra.mxu0 %v1318_v0  ;;  %v99_v0 = vld [vmem:[#allocation8 + $0x70] sm:$0xff] }
  0x62   :  { %1321 = vmatprep.subr.bf16.mxu0 %v1320_v1  ;;  %v100_v1 = vld [vmem:[#allocation8 + $0x78] sm:$0xff] }
  0x63   :  { %1351 = vmatpush3.bf16.msra.mxu1 %v1348_v58  ;;  %v95_v58 = vld [vmem:[#allocation8 + $0x50] sm:$0xff]  ;;  %v1827_v3 = vpack.c.bf16 %v100_v1, %v99_v0  ;;  %v582_v0 = vld [vmem:[#allocation7 + $0x8] sm:$0xff]  ;;  %v613_v1 = vld [vmem:[#allocation7 + $0x100] sm:$0xff] }
  0x64   :  { %1353 = vmatprep.subr.bf16.mxu1 %v1352_v4  ;;  %v1818_v60 = vpack.c.bf16 %v96_v59, %v95_v58  ;;  %v597_v58 = vld [vmem:[#allocation7 + $0x80] sm:$0xff]  ;;  %v598_v59 = vld [vmem:[#allocation7 + $0x88] sm:$0xff] }
  0x65   :  { %1323 = vmatpush3.bf16.msra.mxu0 %v1322_v9  ;;  %v1384_v61 = vpack.c.bf16 %v598_v59, %v597_v58  ;;  %v607_v58 = vld [vmem:[#allocation7 + $0xd0] sm:$0xff]  ;;  %v608_v59 = vld [vmem:[#allocation7 + $0xd8] sm:$0xff] }
  0x66   :  { %1325 = vmatprep.subr.bf16.mxu0 %v1324_v10 }
  0x67   :  { %1355 = vmatpush3.bf16.msra.mxu1 %v1352_v4 }
  0x68   :  { %1357 = vmatprep.subr.bf16.mxu1 %v1356_v15 }
  0x69   :  { %1327 = vmatpush3.bf16.msra.mxu0 %v1326_v17 }
  0x6a   :  { %1360 = vmatprep.subr.bf16.mxu0 %v1611_v44 }
  0x6b   :  { %1359 = vmatpush3.bf16.msra.mxu1 %v1356_v15 }
  0x6c   :  { %969 = vmatmul.mubr.msk.f32.vlgmr.msra.gmra.mrb[0].mxu0 %vm1756_vm2, %v118_v25  ;;  %1385 = vmatprep.subr.bf16.mxu1 %v1384_v61  ;;  %v1404_v61 = vpack.c.bf16 %v608_v59, %v607_v58 }
  0x6d   :  { %309 = vmatprep.mubr.f32.mxu0 %v1739_v52  ;;  %1362 = vmatpush3.bf16.msra.mxu0 %v1797_v43  ;;  %v91_v52 = vld [vmem:[#allocation8 + $0x30] sm:$0xff] }
  0x6e   :  { %1183 = vmatmul.mubr.msk.f32.vlgmr.msra.gmra.mrb[0].mxu1 %vm1764_vm3, %v125_v29  ;;  %1363 = vmatprep.subr.bf16.mxu0 %v1611_v44  ;;  %v1810_v54 = vpack.c.bf16 %v92_v53, %v91_v52 }
  0x6f   :  { %1185 = vmatprep.mubr.f32.mxu1 %v124_v32 }
  0x70   :  { %310 = vmatmul.mubr.f32.gmra.mrb[2].mxu0 %v117_v33 }
  0x71   :  { %314 = vmatprep.mubr.f32.mxu0 %v103_v16  ;;  %1365 = vmatpush3.bf16.msra.mxu0 %v1802_v48 }
  0x72   :  { %1186 = vmatmul.mubr.msk.f32.gmra.mrb[2].mxu1 %vm1781_vm4, %v127_v36  ;;  %1366 = vmatprep.subr.bf16.mxu0 %v1611_v44 }
  0x74   :  { %971 = vmatmul.mubr.msk.f32.gmra.mrb[4].mxu0 %vm1787_vm5, %v116_v38 }
  0x75   :  { %319 = vmatprep.mubr.f32.mxu0 %v104_v13  ;;  %1368 = vmatpush3.bf16.msra.mxu0 %v1806_v51 }
  0x76   :  { %1369 = vmatprep.subr.bf16.mxu0 %v1611_v44 }
  0x78   :  { %320 = vmatmul.mubr.f32.gmra.mrb[6].mxu0 %v115_v40 }
  0x79   :  { %1371 = vmatpush3.bf16.msra.mxu0 %v1810_v54  ;;  %1220 = vmatprep.mubr.msk.f32.mxu0 %vm1612_vm6, %v1613_v2 }
  0x7a   :  { %1372 = vmatprep.subr.bf16.mxu0 %v1611_v44 }
  0x7d   :  { %1374 = vmatpush3.bf16.msra.mxu0 %v1814_v57 }
  0x7e   :  { %1375 = vmatprep.subr.bf16.mxu0 %v1611_v44 }
  0x81   :  { %1377 = vmatpush3.bf16.msra.mxu0 %v1818_v60 }
  0x82   :  { %1378 = vmatprep.subr.bf16.mxu0 %v1611_v44 }
  0x85   :  { %1380 = vmatpush3.bf16.msra.mxu0 %v1822_v63 }
  0x86   :  { %1381 = vmatprep.subr.bf16.mxu0 %v1611_v44 }
  0x89   :  { %1383 = vmatpush3.bf16.msra.mxu0 %v1827_v3 }
 0x13f   :  { %v1020_v4 = vpop.f32.mrb[0].mxu0 }
 0x140   :  { %v1021_v5 = vpop.f32.mrb[1].mxu0 }
 0x141   :  { %v1184_v6 = vpop.f32.mrb[0].mxu1  ;;  %v1022_v7 = vadd.f32 %v1021_v5, %v1020_v4  ;;  %v1386_v4 = vpack.c.bf16 %v582_v0, %v581_v62  ;;  %v614_v5 = vld [vmem:[#allocation7 + $0x108] sm:$0xff]  ;;  %v591_v62 = vld [vmem:[#allocation7 + $0x50] sm:$0xff]  ;;  %v592_v0 = vld [vmem:[#allocation7 + $0x58] sm:$0xff] }
 0x142   :  { %v391_v8 = vpop.f32.mrb[1].mxu1 }
 0x143   :  { %v1831_v9 = vadd.f32 %v1022_v7, %v391_v8  ;;  %v1023_v10 = vpop.f32.mrb[2].mxu0  ;;  %1387 = vmatpush3.bf16.msra.mxu1 %v1386_v4  ;;  %v599_v7 = vld [vmem:[#allocation7 + $0x90] sm:$0xff]  ;;  %v600_v8 = vld [vmem:[#allocation7 + $0x98] sm:$0xff]  ;;  %v1406_v4 = vpack.c.bf16 %v592_v0, %v591_v62 }
 0x144   :  { %v1024_v11 = vpop.f32.mrb[3].mxu0 }
 0x145   :  { %v1187_v12 = vpop.f32.mrb[2].mxu1  ;;  %v1025_v13 = vadd.f32 %v1024_v11, %v1023_v10  ;;  %v421_v23 = vmul.f32 %v1831_v9, %v1831_v9  ;;  %v1388_v10 = vpack.c.bf16 %v600_v8, %v599_v7  ;;  %v583_v11 = vld [vmem:[#allocation7 + $0x10] sm:$0xff]  ;;  %v609_v7 = vld [vmem:[#allocation7 + $0xe0] sm:$0xff]  ;;  %v610_v8 = vld [vmem:[#allocation7 + $0xe8] sm:$0xff] }
 0x146   :  { %v401_v14 = vpop.f32.mrb[3].mxu1 }
 0x147   :  { %v1833_v15 = vadd.f32 %v1184_v6, %v1025_v13  ;;  %v1026_v16 = vpop.f32.mrb[4].mxu0  ;;  %v1416_v6 = vpack.c.bf16 %v614_v5, %v613_v1  ;;  %v615_v13 = vld [vmem:[#allocation7 + $0x110] sm:$0xff]  ;;  %1389 = vmatprep.subr.bf16.mxu1 %v1388_v10  ;;  %v624_v5 = vld [vmem:[#allocation7 + $0x158] sm:$0xff]  ;;  %v1408_v10 = vpack.c.bf16 %v610_v8, %v609_v7 }
 0x148   :  { %v1027_v17 = vpop.f32.mrb[5].mxu0  ;;  %v623_v1 = vld [vmem:[#allocation7 + $0x150] sm:$0xff] }
 0x149   :  { %v1028_v18 = vadd.f32 %v1027_v17, %v1026_v16  ;;  %v422_v19 = vmul.f32 %v1833_v15, %v1833_v15  ;;  %v412_v24 = vadd.f32 %v1833_v15, %v1831_v9  ;;  %1417 = vmatprep.subr.bf16.mxu0 %v1416_v6  ;;  %v616_v16 = vld [vmem:[#allocation7 + $0x118] sm:$0xff] }
 0x14a   :  { %v1420_v17 = vpack.c.bf16 %v616_v16, %v615_v13  ;;  %v625_v13 = vld [vmem:[#allocation7 + $0x160] sm:$0xff]  ;;  %v626_v16 = vld [vmem:[#allocation7 + $0x168] sm:$0xff] }
 0x14b   :  { %v1837_v20 = vadd.f32 %v1028_v18, %v401_v14  ;;  %v1029_v21 = vpop.f32.mrb[6].mxu0  ;;  %v425_v29 = vadd.f32 %v422_v19, %v421_v23  ;;  %v601_v18 = vld [vmem:[#allocation7 + $0xa0] sm:$0xff]  ;;  %v602_v19 = vld [vmem:[#allocation7 + $0xa8] sm:$0xff] }
 0x14c   :  { %v1030_v22 = vpop.f32.mrb[7].mxu0  ;;  %v586_v23 = vld [vmem:[#allocation7 + $0x28] sm:$0xff] }
 0x14d   :  { %v423_v25 = vmul.f32 %v1837_v20, %v1837_v20  ;;  %v1031_v27 = vadd.f32 %v1030_v22, %v1029_v21  ;;  %v413_v28 = vadd.f32 %v412_v24, %v1837_v20  ;;  %v1392_v21 = vpack.c.bf16 %v602_v19, %v601_v18  ;;  %v585_v22 = vld [vmem:[#allocation7 + $0x20] sm:$0xff]  ;;  %v611_v18 = vld [vmem:[#allocation7 + $0xf0] sm:$0xff]  ;;  %v612_v19 = vld [vmem:[#allocation7 + $0xf8] sm:$0xff] }
 0x14e   :  { %v617_v24 = vld [vmem:[#allocation7 + $0x120] sm:$0xff] }
 0x14f   :  { %v1846_v31 = vadd.f32 %v1187_v12, %v1031_v27  ;;  %v426_v32 = vadd.f32 %v425_v29, %v423_v25  ;;  %v584_v12 = vld [vmem:[#allocation7 + $0x18] sm:$0xff]  ;;  %v1394_v25 = vpack.c.bf16 %v586_v23, %v585_v22  ;;  %v618_v27 = vld [vmem:[#allocation7 + $0x128] sm:$0xff]  ;;  %v603_v29 = vld [vmem:[#allocation7 + $0xb0] sm:$0xff] }
 0x150   :  { %v1390_v14 = vpack.c.bf16 %v584_v12, %v583_v11  ;;  %v593_v11 = vld [vmem:[#allocation7 + $0x60] sm:$0xff]  ;;  %v594_v12 = vld [vmem:[#allocation7 + $0x68] sm:$0xff]  ;;  %v595_v22 = vld [vmem:[#allocation7 + $0x70] sm:$0xff] }
 0x151   :  { %v414_v33 = vadd.f32 %v413_v28, %v1846_v31  ;;  %v424_v34 = vmul.f32 %v1846_v31, %v1846_v31  ;;  %v1424_v28 = vpack.c.bf16 %v618_v27, %v617_v24  ;;  %v596_v23 = vld [vmem:[#allocation7 + $0x78] sm:$0xff]  ;;  %v627_v24 = vld [vmem:[#allocation7 + $0x170] sm:$0xff] }
 0x152   :  { %1391 = vmatpush3.bf16.msra.mxu1 %v1390_v14  ;;  %v1410_v14 = vpack.c.bf16 %v594_v12, %v593_v11  ;;  %v628_v27 = vld [vmem:[#allocation7 + $0x178] sm:$0xff] }
 0x153   :  { %v415_v35 = vrot.slane %v414_v33, 4  ;;  %v427_v36 = vadd.f32 %v426_v32, %v424_v34  ;;  %1393 = vmatprep.subr.bf16.mxu1 %v1392_v21  ;;  %v604_v32 = vld [vmem:[#allocation7 + $0xb8] sm:$0xff]  ;;  %v587_v34 = vld [vmem:[#allocation7 + $0x30] sm:$0xff]  ;;  %v1412_v21 = vpack.c.bf16 %v612_v19, %v611_v18 }
 0x155   :  { %v416_v38 = vadd.f32 %v415_v35, %v414_v33  ;;  %v428_v40 = vrot.slane %v427_v36, 4  ;;  %v1396_v33 = vpack.c.bf16 %v604_v32, %v603_v29  ;;  %v588_v35 = vld [vmem:[#allocation7 + $0x38] sm:$0xff] }
 0x156   :  { %1395 = vmatpush3.bf16.msra.mxu1 %v1394_v25  ;;  %v1414_v25 = vpack.c.bf16 %v596_v23, %v595_v22 }
 0x157   :  { %v417_v41 = vrot.slane %v416_v38, 2  ;;  %v429_v42 = vadd.f32 %v428_v40, %v427_v36  ;;  %v619_v36 = vld [vmem:[#allocation7 + $0x130] sm:$0xff]  ;;  %v620_v40 = vld [vmem:[#allocation7 + $0x138] sm:$0xff]  ;;  %1397 = vmatprep.subr.bf16.mxu1 %v1396_v33 }
 0x159   :  { %v418_v45 = vadd.f32 %v417_v41, %v416_v38  ;;  %v430_v46 = vrot.slane %v429_v42, 2  ;;  %v1398_v38 = vpack.c.bf16 %v588_v35, %v587_v34  ;;  %v1428_v41 = vpack.c.bf16 %v620_v40, %v619_v36 }
 0x15b   :  { %v419_v49 = vrot.slane %v418_v45, 1  ;;  %v431_v50 = vadd.f32 %v430_v46, %v429_v42  ;;  %1399 = vmatpush3.bf16.msra.mxu1 %v1398_v38  ;;  %v605_v42 = vld [vmem:[#allocation7 + $0xc0] sm:$0xff]  ;;  %v1614_v38 = vmov 1966171168  }
 0x15c   :  { %v515_v40 = vunpack.c.l.s4 %v1614_v38 }
 0x15d   :  { %v432_v52 = vrot.slane %v431_v50, 1  ;;  %v420_v53 = vadd.f32 %v419_v49, %v418_v45  ;;  %v606_v45 = vld [vmem:[#allocation7 + $0xc8] sm:$0xff]  ;;  %v589_v49 = vld [vmem:[#allocation7 + $0x40] sm:$0xff] }
 0x15e   :  { %v1400_v46 = vpack.c.bf16 %v606_v45, %v605_v42 }
 0x15f   :  { %v433_v55 = vadd.f32 %v432_v52, %v431_v50  ;;  %v590_v50 = vld [vmem:[#allocation7 + $0x48] sm:$0xff]  ;;  %v621_v52 = vld [vmem:[#allocation7 + $0x140] sm:$0xff] }
 0x160   :  { %1401 = vmatprep.subr.bf16.mxu1 %v1400_v46 }
 0x161   :  { %v435_v56 = vsel %vm434_vm7, %v420_v53, %v433_v55  ;;  %v1402_v53 = vpack.c.bf16 %v590_v50, %v589_v49  ;;  %v622_v55 = vld [vmem:[#allocation7 + $0x148] sm:$0xff]  ;;  %v410_v50 = vld [vmem:[%s1942_s2] sm:$0x1] }
 0x162   :  { %1221 = vmatmul.mubr.f32.vlgmr.msra.gmra.mrb[8].mxu0 %v435_v56  ;;  %v1432_v56 = vpack.c.bf16 %v622_v55, %v621_v52 }
 0x163   :  { %1419 = vmatpush3.bf16.msra.mxu0 %v1416_v6  ;;  %1403 = vmatpush3.bf16.msra.mxu1 %v1402_v53  ;;  %v1436_v6 = vpack.c.bf16 %v624_v5, %v623_v1  ;;  %v1862_v53 = vsub.s32 0, %v1735_v47 }
 0x164   :  { %1421 = vmatprep.subr.bf16.mxu0 %v1420_v17  ;;  %1405 = vmatprep.subr.bf16.mxu1 %v1404_v61 }
 0x167   :  { %1423 = vmatpush3.bf16.msra.mxu0 %v1420_v17  ;;  %1407 = vmatpush3.bf16.msra.mxu1 %v1406_v4  ;;  %v1440_v17 = vpack.c.bf16 %v626_v16, %v625_v13 }
 0x168   :  { %1425 = vmatprep.subr.bf16.mxu0 %v1424_v28  ;;  %1409 = vmatprep.subr.bf16.mxu1 %v1408_v10 }
 0x16b   :  { %1427 = vmatpush3.bf16.msra.mxu0 %v1424_v28  ;;  %1411 = vmatpush3.bf16.msra.mxu1 %v1410_v14  ;;  %v1444_v28 = vpack.c.bf16 %v628_v27, %v627_v24 }
 0x16c   :  { %1429 = vmatprep.subr.bf16.mxu0 %v1428_v41  ;;  %1413 = vmatprep.subr.bf16.mxu1 %v1412_v21 }
 0x16f   :  { %1431 = vmatpush3.bf16.msra.mxu0 %v1428_v41  ;;  %1415 = vmatpush3.bf16.msra.mxu1 %v1414_v25  ;;  %v516_v41 = vunpack.c.0.s8 %v515_v40 }
 0x170   :  { %1433 = vmatprep.subr.bf16.mxu0 %v1432_v56  ;;  %1448 = vmatprep.subr.bf16.mxu1 %v1611_v44 }
 0x171   :  { %v1854_v42 = vsub.s32 %v516_v41, %v1735_v47 }
 0x173   :  { %1435 = vmatpush3.bf16.msra.mxu0 %v1432_v56  ;;  %v411_v56 = vld [vmem:[%s1943_s3] sm:$0x1] }
 0x174   :  { %1437 = vmatprep.subr.bf16.mxu0 %v1436_v6 }
 0x177   :  { %1439 = vmatpush3.bf16.msra.mxu0 %v1436_v6 }
 0x178   :  { %1441 = vmatprep.subr.bf16.mxu0 %v1440_v17 }
 0x17b   :  { %1443 = vmatpush3.bf16.msra.mxu0 %v1440_v17 }
 0x17c   :  { %1445 = vmatprep.subr.bf16.mxu0 %v1444_v28 }
 0x17f   :  { %1447 = vmatpush3.bf16.msra.mxu0 %v1444_v28 }
 0x235   :  { %v502_v29 = vpop.f32.mrb[8].mxu0 }
 0x236   :  { %v506_v32 = vmul.f32 %v502_v29, %v502_v29  ;;  %v1222_v33 = vpop.f32.mrb[9].mxu0 }
 0x238   :  { %v508_v34 = vrot.slane %v506_v32, 7 }
 0x23a   :  { %v510_v35 = vsub.f32 %v502_v29, %v508_v34 }
 0x23c   :  { %v511_v36 = vadd.f32 1e-05, %v510_v35 }
 0x23e   :  { %1483 = vrsqrt.f32 %v511_v36 }
 0x248   :  { %v1484_v45 = vpop.eup %1483 }
 0x249   :  { %v520_v46 = vrot.slane %v1484_v45, %v1854_v42 }
 0x24b   :  { %v521_v49 = vcombine.high %v520_v46, %v520_v46 }
 0x24d   :  { %v528_v52 = vrot.slane %v521_v49, %v1854_v42 }
 0x24f   :  { %v530_v55 = vmul.f32 %v528_v52, %v410_v50 }
 0x251   :  { %v531_v58 = vmul.f32 %v530_v55, %v502_v29  ;;  %v537_v59 = vrot.slane %v530_v55, %v1862_v53 }
 0x253   :  { %v532_v61 = vsub.f32 %v411_v56, %v531_v58  ;;  %v541_v62 = vmul.f32 %v537_v59, %v1837_v20  ;;  %v542_v0 = vmul.f32 %v537_v59, %v1846_v31  ;;  %v539_v4 = vmul.f32 %v537_v59, %v1831_v9 }
 0x254   :  { %v540_v5 = vmul.f32 %v537_v59, %v1833_v15 }
 0x255   :  { %v547_v1 = vrot.slane %v532_v61, %v1862_v53 }
 0x257   :  { %v552_v6 = vadd.f32 %v547_v1, %v542_v0  ;;  %v549_v7 = vadd.f32 %v547_v1, %v539_v4  ;;  %v550_v8 = vadd.f32 %v547_v1, %v540_v5  ;;  %v551_v10 = vadd.f32 %v547_v1, %v541_v62 }
 0x259   :  { %v556_v11 = vmax.f32 %v552_v6, 0.0  ;;  %v553_v12 = vmax.f32 %v549_v7, 0.0  ;;  %v554_v13 = vmax.f32 %v550_v8, 0.0  ;;  %v555_v14 = vmax.f32 %v551_v10, 0.0 }
 0x25b   :  { %v557_v16 = vrot.slane %v553_v12, 7  ;;  %693 = vmatprep.mubr.f32.mxu1 %v553_v12  ;;  %v560_v17 = vrot.slane %v556_v11, 7  ;;  %v565_v20 = vrot.slane %v553_v12, 1  ;;  %v566_v18 = vrot.slane %v554_v13, 1 }
 0x25c   :  { %v567_v31 = vrot.slane %v555_v14, 1  ;;  %v568_v19 = vrot.slane %v556_v11, 1  ;;  %v558_v21 = vrot.slane %v554_v13, 7  ;;  %v559_v25 = vrot.slane %v555_v14, 7 }
 0x25d   :  { %v564_v9 = vsel %vm114_vm1, %v560_v17, %v557_v16  ;;  %v571_v15 = vsel %vm123_vm0, %v565_v20, %v566_v18 }
 0x25e   :  { %977 = vmatmul.mubr.msk.f32.vlgmr.msra.gmra.mrb[4].mxu1 %vm1756_vm2, %v564_v9  ;;  %1255 = vmatprep.mubr.f32.mxu0 %v571_v15  ;;  %v570_v22 = vsel %vm123_vm0, %v566_v18, %v567_v31  ;;  %v569_v23 = vsel %vm123_vm0, %v567_v31, %v568_v19  ;;  %v563_v24 = vsel %vm114_vm1, %v557_v16, %v558_v21  ;;  %v799_v9 = vld [vmem:[%s1945_s5] sm:$0x1]  ;;  %s1575_s5 = scalar_lea.vmem %s955_s16, 512 }
 0x25f   :  { %698 = vmatprep.mubr.f32.mxu1 %v554_v13  ;;  %1256 = vmatmul.mubr.msk.f32.vlgmr.msra.gmra.mrb[10].mxu0 %vm1764_vm3, %v570_v22  ;;  %v572_v26 = vsel %vm123_vm0, %v568_v19, %v565_v20  ;;  %v562_v30 = vsel %vm114_vm1, %v558_v21, %v559_v25  ;;  %v800_v22 = vld [vmem:[%s1946_s6] sm:$0x1]  ;;  %p1576_p4 = scmp.ne.s32.totalorder %s955_s16, %s1575_s5  ;;  %p1581_p6 = scmp.lt.s32.totalorder %s1575_s5, %s1575_s5 }
 0x260   :  { %1258 = vmatprep.mubr.f32.mxu0 %v569_v23  ;;  %1450 = vmatpush3.bf16.msra.mxu1 %v1797_v43  ;;  %v561_v43 = vsel %vm114_vm1, %v559_v25, %v560_v17 }
 0x261   :  { %1451 = vmatprep.subr.bf16.mxu1 %v1611_v44  ;;  %p1582_p7 = por %p1581_p6, %p1580_p5 }
 0x262   :  { %699 = vmatmul.mubr.f32.gmra.mrb[6].mxu1 %v563_v24 }
 0x263   :  { %703 = vmatprep.mubr.f32.mxu1 %v555_v14  ;;  %1259 = vmatmul.mubr.msk.f32.gmra.mrb[12].mxu0 %vm1781_vm4, %v572_v26  ;;  %p1583_p8 = pnand %p1582_p7, %p1576_p4 }
 0x264   :  { %1453 = vmatpush3.bf16.msra.mxu1 %v1802_v48 }
 0x265   :  { %1454 = vmatprep.subr.bf16.mxu1 %v1611_v44 }
 0x266   :  { %979 = vmatmul.mubr.msk.f32.gmra.mrb[8].mxu1 %vm1787_vm5, %v562_v30 }
 0x267   :  { %708 = vmatprep.mubr.f32.mxu1 %v556_v11 }
 0x268   :  { %1456 = vmatpush3.bf16.msra.mxu1 %v1806_v51 }
 0x269   :  { %1457 = vmatprep.subr.bf16.mxu1 %v1611_v44 }
 0x26a   :  { %709 = vmatmul.mubr.f32.gmra.mrb[10].mxu1 %v561_v43 }
 0x26b   :  { %1293 = vmatprep.mubr.msk.f32.mxu1 %vm1612_vm6, %v1613_v2 }
 0x26c   :  { %1459 = vmatpush3.bf16.msra.mxu1 %v1810_v54 }
 0x26d   :  { %1460 = vmatprep.subr.bf16.mxu1 %v1611_v44 }
 0x270   :  { %1462 = vmatpush3.bf16.msra.mxu1 %v1814_v57 }
 0x271   :  { %1463 = vmatprep.subr.bf16.mxu1 %v1611_v44 }
 0x274   :  { %1465 = vmatpush3.bf16.msra.mxu1 %v1818_v60 }
 0x275   :  { %1466 = vmatprep.subr.bf16.mxu1 %v1611_v44 }
 0x278   :  { %1468 = vmatpush3.bf16.msra.mxu1 %v1822_v63 }
 0x279   :  { %1469 = vmatprep.subr.bf16.mxu1 %v1611_v44 }
 0x27c   :  { %1471 = vmatpush3.bf16.msra.mxu1 %v1827_v3 }
 0x331   :  { %v1101_v47 = vpop.f32.mrb[4].mxu1 }
 0x332   :  { %v1102_v37 = vpop.f32.mrb[5].mxu1  ;;  %v1257_v39 = vpop.f32.mrb[10].mxu0 }
 0x333   :  { %v1103_v48 = vadd.f32 %v1102_v37, %v1101_v47  ;;  %v780_v51 = vpop.f32.mrb[11].mxu0 }
 0x335   :  { %v781_v54 = vadd.f32 %v1103_v48, %v780_v51  ;;  %v1104_v2 = vpop.f32.mrb[6].mxu1 }
 0x336   :  { %v1105_v57 = vpop.f32.mrb[7].mxu1  ;;  %v1260_v27 = vpop.f32.mrb[12].mxu0 }
 0x337   :  { %v1106_v28 = vadd.f32 %v1105_v57, %v1104_v2  ;;  %v790_v29 = vpop.f32.mrb[13].mxu0  ;;  %v810_v3 = vmul.f32 %v781_v54, %v781_v54 }
 0x339   :  { %v786_v60 = vadd.f32 %v1257_v39, %v1106_v28  ;;  %v1107_v32 = vpop.f32.mrb[8].mxu1 }
 0x33a   :  { %v1108_v33 = vpop.f32.mrb[9].mxu1 }
 0x33b   :  { %v1109_v34 = vadd.f32 %v1108_v33, %v1107_v32  ;;  %v811_v63 = vmul.f32 %v786_v60, %v786_v60  ;;  %v801_v38 = vadd.f32 %v786_v60, %v781_v54 }
 0x33d   :  { %v791_v35 = vadd.f32 %v1109_v34, %v790_v29  ;;  %v1110_v44 = vpop.f32.mrb[10].mxu1  ;;  %v814_v45 = vadd.f32 %v811_v63, %v810_v3 }
 0x33e   :  { %v1111_v36 = vpop.f32.mrb[11].mxu1 }
 0x33f   :  { %v812_v40 = vmul.f32 %v791_v35, %v791_v35  ;;  %v1112_v41 = vadd.f32 %v1111_v36, %v1110_v44  ;;  %v802_v46 = vadd.f32 %v801_v38, %v791_v35 }
 0x341   :  { %v796_v49 = vadd.f32 %v1260_v27, %v1112_v41  ;;  %v815_v50 = vadd.f32 %v814_v45, %v812_v40 }
 0x343   :  { %v803_v52 = vadd.f32 %v802_v46, %v796_v49  ;;  %v813_v55 = vmul.f32 %v796_v49, %v796_v49 }
 0x345   :  { %v804_v56 = vrot.slane %v803_v52, 4  ;;  %v816_v58 = vadd.f32 %v815_v50, %v813_v55 }
 0x347   :  { %v805_v59 = vadd.f32 %v804_v56, %v803_v52  ;;  %v817_v61 = vrot.slane %v816_v58, 4 }
 0x349   :  { %v806_v62 = vrot.slane %v805_v59, 2  ;;  %v818_v0 = vadd.f32 %v817_v61, %v816_v58 }
 0x34b   :  { %v807_v1 = vadd.f32 %v806_v62, %v805_v59  ;;  %v819_v4 = vrot.slane %v818_v0, 2 }
 0x34d   :  { %v808_v5 = vrot.slane %v807_v1, 1  ;;  %v820_v6 = vadd.f32 %v819_v4, %v818_v0 }
 0x34f   :  { %v821_v7 = vrot.slane %v820_v6, 1  ;;  %v809_v8 = vadd.f32 %v808_v5, %v807_v1 }
 0x351   :  { %v822_v10 = vadd.f32 %v821_v7, %v820_v6 }
 0x353   :  { %v823_v11 = vsel %vm434_vm7, %v809_v8, %v822_v10 }
 0x354   :  { %1294 = vmatmul.mubr.f32.vlgmr.msra.gmra.mrb[12].mxu1 %v823_v11 }
 0x427   :  { %v890_v12 = vpop.f32.mrb[12].mxu1 }
 0x428   :  { %v894_v13 = vmul.f32 %v890_v12, %v890_v12  ;;  %v1295_v14 = vpop.f32.mrb[13].mxu1 }
 0x42a   :  { %v896_v16 = vrot.slane %v894_v13, 7 }
 0x42c   :  { %v898_v17 = vsub.f32 %v890_v12, %v896_v16 }
 0x42e   :  { %v899_v20 = vadd.f32 1e-05, %v898_v17 }
 0x430   :  { %1485 = vrsqrt.f32 %v899_v20 }
 0x43a   :  { %v1486_v18 = vpop.eup %1485 }
 0x43b   :  { %v908_v31 = vrot.slane %v1486_v18, %v1854_v42 }
 0x43d   :  { %v909_v19 = vcombine.high %v908_v31, %v908_v31 }
 0x43f   :  { %v916_v15 = vrot.slane %v909_v19, %v1854_v42 }
 0x441   :  { %v918_v21 = vmul.f32 %v916_v15, %v799_v9 }
 0x443   :  { %v919_v23 = vmul.f32 %v918_v21, %v890_v12  ;;  %v925_v24 = vrot.slane %v918_v21, %v1862_v53 }
 0x445   :  { %v920_v25 = vsub.f32 %v800_v22, %v919_v23  ;;  %v927_v26 = vmul.f32 %v925_v24, %v781_v54  ;;  %v928_v43 = vmul.f32 %v925_v24, %v786_v60  ;;  %v929_v47 = vmul.f32 %v925_v24, %v791_v35 }
 0x446   :  { %v930_v37 = vmul.f32 %v925_v24, %v796_v49 }
 0x447   :  { %v935_v30 = vrot.slane %v920_v25, %v1862_v53 }
 0x449   :  { %v937_v39 = vadd.f32 %v935_v30, %v927_v26  ;;  %v938_v48 = vadd.f32 %v935_v30, %v928_v43  ;;  %v939_v42 = vadd.f32 %v935_v30, %v929_v47  ;;  %v940_v51 = vadd.f32 %v935_v30, %v930_v37 }
 0x44b   :  { %v941_v2 = vmax.f32 %v937_v39, 0.0  ;;  %v942_v57 = vmax.f32 %v938_v48, 0.0  ;;  %v943_v27 = vmax.f32 %v939_v42, 0.0  ;;  %v944_v28 = vmax.f32 %v940_v51, 0.0 }
 0x44d   :  { %945 = vst [vmem:[#allocation10] sm:$0xff] %v941_v2  ;;  %946 = vst [vmem:[#allocation10 + $0x8] sm:$0xff] %v942_v57 }
 0x44e   :  { %947 = vst [vmem:[#allocation10 + $0x10] sm:$0xff] %v943_v27  ;;  %948 = vst [vmem:[#allocation10 + $0x18] sm:$0xff] %v944_v28 }
 0x44f   :  { %1586 = shalt.err (!%p1583_p8)
}
 0x450   :  { %s1587_s20 = scalar_lea.hbm %s1948_s8, 512 }
 0x451   :  { %p1588_p9 = scmp.ne.s32.totalorder %s1948_s8, %s1587_s20  ;;  %p1591_p10 = scmp.lt.u32.totalorder %s1587_s20, %s1948_s8 }
 0x453   :  { %p1593_p11 = pnand %p1591_p10, %p1588_p9 }
 0x455   :  { %1596 = shalt.err (!%p1593_p11)
}
 0x456   :  { %960 = dma.vmem_to_hbm [thread:$0]  %s955_s16, 512, %s1948_s8, [#allocation4], %s1607_s17, %s1607_s17, %s1608_s18  }
 0x457   :  { %1603 = dma.done.wait [#allocation4], 512  }
 0x458   :  { %1604 = vsyncadd [#allocation4], 4294966784 }
 0x459   :  { %964 = vsyncpa [#allocation3], 1 }
 0x45a   :  { %965 = vsyncpa [#allocation6], 1 }
 0x45b   :  { %966 = vsyncpa [#allocation9], 1 }
 0x45c   :  { %967 = vsyncpa [#allocation4], 1 }

</bundles_post_ra>
